<compile_context>
chip_gen: v7x
topology: tpu7x:2x2x1
jax: 0.10.0
libtpu: 0.0.40
codegen_flags: <defaults>
</compile_context>

<pallas_src>
import functools

import jax
import jax.numpy as jnp
from jax.experimental import pallas as pl
from jax.experimental.pallas import tpu as pltpu


# --------------------------------------------------------------------------
# per-generation VMEM budgets
# --------------------------------------------------------------------------
def _vmem_budgets():
    """vmem_limit_bytes + per-step block budget, gated on the TPU generation."""
    cap = 64 << 20  # conservative default (v7x: 64 MiB VMEM per TensorCore)
    try:
        info = pltpu.get_tpu_info()
        cap = int(getattr(info, "vmem_capacity_bytes", cap) or cap)
    except Exception:
        pass
    if cap >= (96 << 20):                 # v5e / v6e: 128 MiB physical VMEM
        return {"vmem_limit": 96 << 20, "block_budget": 20 << 20}
    return {"vmem_limit": 48 << 20, "block_budget": 10 << 20}      # v7x


# --------------------------------------------------------------------------
# weight-resident linear (projection) kernels
# --------------------------------------------------------------------------
def _linear_kernel(x_ref, w_ref, o_ref):
    o_ref[...] = jnp.dot(x_ref[...], w_ref[...],
                         preferred_element_type=jnp.float32).astype(o_ref.dtype)


def _linear_bias_kernel(x_ref, w_ref, b_ref, o_ref):
    acc = jnp.dot(x_ref[...], w_ref[...], preferred_element_type=jnp.float32)
    o_ref[...] = (acc + b_ref[...].astype(jnp.float32)).astype(o_ref.dtype)


def _choose_tiles(M, Din, Dout, itemsize, budget):
    """Largest (bm, bn) whose double-buffered footprint fits the VMEM budget.

    Prefers bn == Dout: fully VMEM-resident weight, single M grid axis."""
    def foot(bm, bn):
        # x + out blocks double-buffered, weight (+bias) double-buffer worst case
        return (2 * bm * (Din + bn) + 2 * Din * bn + 2 * bn) * itemsize

    for bn in (Dout, 512, 256, 128):
        bn = min(bn, Dout)
        for bm in (1024, 512, 256, 128, 64, 32, 16, 8):
            if foot(bm, bn) <= budget:
                return min(bm, M), bn
    return 8, min(128, Dout)   # last resort (never hit at motion-module shapes)


def pallas_linear(x2d, w, bias=None, *, out_dtype=None):
    """x2d: (M, Din), w: (Din, Dout), bias: (1, Dout) or None -> (M, Dout).

    No K reduction axis: Din is small for this layer, so every grid step runs
    the full contraction on the MXU (f32 accumulate) in one shot."""
    M, Din = x2d.shape
    Dout = w.shape[1]
    out_dtype = out_dtype or x2d.dtype
    itemsize = x2d.dtype.itemsize

    budgets = _vmem_budgets()
    bm, bn = _choose_tiles(M, Din, Dout, itemsize, budgets["block_budget"])

    # N outer / M inner: in the common bn == Dout case the weight is fetched
    # once and the activation streams from HBM exactly once (no re-reads).
    grid = (pl.cdiv(Dout, bn), pl.cdiv(M, bm))

    cost = pl.CostEstimate(
        flops=2 * M * Din * Dout,
        transcendentals=0,
        bytes_accessed=(M * Din + Din * Dout + M * Dout) * itemsize,
    )
    compiler_params = pltpu.CompilerParams(
        dimension_semantics=("parallel", "parallel"),
        vmem_limit_bytes=budgets["vmem_limit"],
    )
    out_shape = jax.ShapeDtypeStruct((M, Dout), out_dtype)

    x_spec = pl.BlockSpec((bm, Din), lambda j, i: (i, 0))
    w_spec = pl.BlockSpec((Din, bn), lambda j, i: (0, j))
    o_spec = pl.BlockSpec((bm, bn), lambda j, i: (i, j))

    if bias is None:
        return pl.pallas_call(
            _linear_kernel,
            out_shape=out_shape,
            grid=grid,
            in_specs=[x_spec, w_spec],
            out_specs=o_spec,
            compiler_params=compiler_params,
            cost_estimate=cost,
        )(x2d, w)

    b_spec = pl.BlockSpec((1, bn), lambda j, i: (0, j))
    return pl.pallas_call(
        _linear_bias_kernel,
        out_shape=out_shape,
        grid=grid,
        in_specs=[x_spec, w_spec, b_spec],
        out_specs=o_spec,
        compiler_params=compiler_params,
        cost_estimate=cost,
    )(x2d, w, bias)


# --------------------------------------------------------------------------
# attention kernel (heads kept fused in the channel dim; no XLA transposes)
# --------------------------------------------------------------------------
def _attention_kernel(q_ref, kv_ref, o_ref, *, heads, dim_head):
    # q_ref:  (Gb, Nq, heads*dim_head)   -- q already scaled (scale folded into Wq)
    # kv_ref: (Gb, Nk, 2*heads*dim_head) -- [K | V] packed along the channel dim
    inner = heads * dim_head
    q = q_ref[...]
    kv = kv_ref[...]

    # TODO(synk): a head-major Q/KV layout would make these per-head lane slices
    #             128-aligned; kept channel-fused to avoid XLA transposes.
    # TODO(synk): packed-heads softmax / online-softmax Nk tiling not needed at
    #             motion-module frame counts (Nk ~ 16..32); score tiles fit VMEM.
    for h in range(heads):  # static unrolled loop over heads
        lo = h * dim_head
        q_h = q[:, :, lo:lo + dim_head]                       # (Gb, Nq, Dh)
        k_h = kv[:, :, lo:lo + dim_head]                      # (Gb, Nk, Dh)
        v_h = kv[:, :, inner + lo:inner + lo + dim_head]      # (Gb, Nk, Dh)

        # batched contraction over Dh; bf16 MXU operands, f32 accumulate
        s = jnp.einsum("gqd,gkd->gqk", q_h, k_h,
                       preferred_element_type=jnp.float32)    # (Gb, Nq, Nk) f32
        m = jnp.max(s, axis=-1, keepdims=True)
        p = jnp.exp(s - m)
        # approx reciprocal runs on the EUP slot; rel err ~2^-12, inference-safe
        p = p * pl.reciprocal(jnp.sum(p, axis=-1, keepdims=True), approx=True)
        o_h = jnp.einsum("gqk,gkd->gqd", p.astype(v_h.dtype), v_h,
                         preferred_element_type=jnp.float32)  # (Gb, Nq, Dh) f32

        # stream this head's result straight into the output block (no concat)
        o_ref[:, :, lo:lo + dim_head] = o_h.astype(o_ref.dtype)


def _pick_batch_group(B, Nq, Nk, inner, dim_head, itemsize, budget, cap=128):
    """Largest divisor of B whose double-buffered block footprint plus the
    in-kernel f32 temporaries stays under the per-generation VMEM budget."""
    def foot(g):
        blocks = 2 * g * (2 * Nq * inner + 2 * Nk * inner) * itemsize  # q, out, kv
        temps = g * (2 * Nq * Nk + Nq * dim_head + Nq * inner) * 4     # s, p, o_h
        return blocks + temps

    limit = min(B, cap)
    if B >= 2:
        # keep at least 2 grid steps so the v7x dual TensorCore stays busy
        limit = min(limit, max(1, B // 2))
    best = 1
    # TODO(synk): a prime/awkward B degrades to gb=1 (correct but slow); a
    #             cdiv grid with a masked trailing group would fix it.
    for cand in range(1, limit + 1):
        if B % cand == 0 and foot(cand) <= budget:
            best = cand
    return best


def pallas_attention(q, kv, *, heads, dim_head):
    """q: (B, Nq, inner), kv: (B, Nk, 2*inner) -> (B, Nq, inner)."""
    B, Nq, inner = q.shape
    Nk = kv.shape[1]
    itemsize = q.dtype.itemsize
    budgets = _vmem_budgets()
    gb = _pick_batch_group(B, Nq, Nk, inner, dim_head, itemsize,
                           budgets["block_budget"])

    kernel = functools.partial(_attention_kernel, heads=heads, dim_head=dim_head)
    cost = pl.CostEstimate(
        flops=4 * B * heads * Nq * Nk * dim_head,
        transcendentals=B * heads * Nq * Nk,
        bytes_accessed=(2 * q.size + kv.size) * itemsize,
    )
    return pl.pallas_call(
        kernel,
        out_shape=jax.ShapeDtypeStruct((B, Nq, inner), q.dtype),
        grid=(B // gb,),
        in_specs=[
            pl.BlockSpec((gb, Nq, inner), lambda b: (b, 0, 0)),
            pl.BlockSpec((gb, Nk, 2 * inner), lambda b: (b, 0, 0)),
        ],
        out_specs=pl.BlockSpec((gb, Nq, inner), lambda b: (b, 0, 0)),
        compiler_params=pltpu.CompilerParams(
            dimension_semantics=("parallel",),
            vmem_limit_bytes=budgets["vmem_limit"],
        ),
        cost_estimate=cost,
    )(q, kv)


# --------------------------------------------------------------------------
# CrossAttentionMM parameters + forward
# --------------------------------------------------------------------------
def init_params(key, query_dim, context_dim, heads, dim_head, dtype=jnp.float32):
    """Raw parameters in the (in, out) orientation actually used: y = x @ W."""
    inner_dim = heads * dim_head
    k1, k2, k3, k4, k5 = jax.random.split(key, 5)
    s = 0.02
    return {
        "wq": (jax.random.normal(k1, (query_dim, inner_dim)) * s).astype(dtype),
        "wk": (jax.random.normal(k2, (context_dim, inner_dim)) * s).astype(dtype),
        "wv": (jax.random.normal(k3, (context_dim, inner_dim)) * s).astype(dtype),
        "wo": (jax.random.normal(k4, (inner_dim, query_dim)) * s).astype(dtype),
        "bo": (jax.random.normal(k5, (1, query_dim)) * s).astype(dtype),
    }


def prepare_params(params, heads, dim_head, compute_dtype=jnp.bfloat16):
    """One-time weight preparation: fold the default softmax scale into Wq,
    pack the fused-KV weight, and cast everything to the compute dtype."""
    scale = dim_head ** (-0.5)
    wq_scaled = (params["wq"].astype(jnp.float32) * scale).astype(compute_dtype)
    wk = params["wk"].astype(compute_dtype)
    wv = params["wv"].astype(compute_dtype)
    return {
        "wq_scaled": wq_scaled,
        "wkv": jnp.concatenate([wk, wv], axis=1),
        "wk": wk,
        "wv": wv,
        "wo": params["wo"].astype(compute_dtype),
        "bo": params["bo"].astype(compute_dtype),
    }


def cross_attention_mm_forward(prepared, x, context=None, value=None,
                               heads=8, dim_head=64,
                               compute_dtype=jnp.bfloat16):
    # TODO(synk): mask / scale_mask / self.scale paths are not implemented
    #             (they are None in the module's default inference path).
    if context is None:
        context = x

    out_dtype = x.dtype
    B, Nq, Dq = x.shape
    Nk = context.shape[1]
    inner = heads * dim_head

    xc = x.astype(compute_dtype)
    cc = context.astype(compute_dtype)

    # Q projection (softmax scale pre-folded into Wq by prepare_params)
    q = pallas_linear(xc.reshape(B * Nq, Dq), prepared["wq_scaled"]
                      ).reshape(B, Nq, inner)

    if value is None or value is context:
        # fused K/V projection: context read from HBM once, one kernel launch
        kv = pallas_linear(cc.reshape(B * Nk, cc.shape[-1]), prepared["wkv"]
                           ).reshape(B, Nk, 2 * inner)
    else:
        assert value.shape[1] == Nk, (
            "value must have the same sequence length as context")
        vc = value.astype(compute_dtype)
        k = pallas_linear(cc.reshape(B * Nk, cc.shape[-1]), prepared["wk"])
        v = pallas_linear(vc.reshape(B * Nk, vc.shape[-1]), prepared["wv"])
        kv = jnp.concatenate([k, v], axis=-1).reshape(B, Nk, 2 * inner)

    # attention in (B, N, heads*dim_head) layout (no head split/merge transposes)
    out = pallas_attention(q, kv, heads=heads, dim_head=dim_head)  # (B, Nq, inner)

    # to_out: Linear(inner, query_dim) + bias; Dropout(0.0) == identity
    out = pallas_linear(out.reshape(B * Nq, inner), prepared["wo"],
                        prepared["bo"], out_dtype=out_dtype)
    return out.reshape(B, Nq, Dq)


# --------------------------------------------------------------------------
# pure-JAX f32 reference
# --------------------------------------------------------------------------
def reference_forward(params, x, context, heads, dim_head):
    if context is None:
        context = x
    B, Nq, Dq = x.shape
    Nk = context.shape[1]
    inner = heads * dim_head
    q = x @ params["wq"]
    k = context @ params["wk"]
    v = context @ params["wv"]

    def split(t, n):
        return t.reshape(B, n, heads, dim_head).transpose(0, 2, 1, 3)

    qh, kh, vh = split(q, Nq), split(k, Nk), split(v, Nk)
    s = jnp.einsum("bhqd,bhkd->bhqk", qh, kh) * (dim_head ** -0.5)
    p = jax.nn.softmax(s, axis=-1)
    o = jnp.einsum("bhqk,bhkd->bhqd", p, vh)
    o = o.transpose(0, 2, 1, 3).reshape(B, Nq, inner)
    return o @ params["wo"] + params["bo"][0]


if __name__ == "__main__":
    # small shapes consistent with the module (temporal attention over frames)
    B, Nq, Nk = 2, 16, 8
    query_dim = 32
    context_dim = 32
    heads = 4
    dim_head = 8

    key = jax.random.PRNGKey(0)
    kx, kc, kp = jax.random.split(key, 3)
    x = jax.random.normal(kx, (B, Nq, query_dim), dtype=jnp.float32)
    context = jax.random.normal(kc, (B, Nk, context_dim), dtype=jnp.float32)
    params = init_params(kp, query_dim, context_dim, heads, dim_head)
    prepared = prepare_params(params, heads, dim_head)   # bf16, scale folded

    out = cross_attention_mm_forward(prepared, x, context=context,
                                     heads=heads, dim_head=dim_head)
    out = jax.block_until_ready(out)

    ref = reference_forward(params, x, context, heads, dim_head)
    assert out.shape == (B, Nq, query_dim)
    # bf16 compute path + approx-reciprocal softmax vs f32 reference
    assert jnp.allclose(out, ref, atol=5e-3, rtol=5e-2), "mismatch vs reference"

    print("KERNEL_OK")
</pallas_src>

<mosaic_0001>
module attributes {stable_mosaic.version = 11 : i64} {
  func.func @_linear_kernel(%arg0: i32, %arg1: i32, %arg2: memref<32x32xbf16, #tpu.memory_space<vmem>>, %arg3: memref<32x32xbf16, #tpu.memory_space<vmem>>, %arg4: memref<32x32xbf16, #tpu.memory_space<vmem>>) attributes {dimension_semantics = [#tpu.dimension_semantics<parallel>, #tpu.dimension_semantics<parallel>], iteration_bounds = array<i64: 1, 1>, scalar_prefetch = 0 : i64, scratch_operands = 0 : i64, tpu.core_type = #tpu.core_type<tc>, window_params = [{transform_indices = @transform_0, window_bounds = array<i64: 32, 32>}, {transform_indices = @transform_1, window_bounds = array<i64: 32, 32>}, {transform_indices = @transform_2, window_bounds = array<i64: 32, 32>}]} {
    %c0 = arith.constant 0 : index
    %c0_0 = arith.constant 0 : index
    %0 = vector.load %arg2[%c0, %c0_0] : memref<32x32xbf16, #tpu.memory_space<vmem>>, vector<32x32xbf16>
    %c0_1 = arith.constant 0 : index
    %c0_2 = arith.constant 0 : index
    %1 = vector.load %arg3[%c0_1, %c0_2] : memref<32x32xbf16, #tpu.memory_space<vmem>>, vector<32x32xbf16>
    %cst = arith.constant dense<0.000000e+00> : vector<32x32xf32>
    %2 = tpu.matmul %0, %1, %cst {dimension_numbers = #tpu.dot_dimension_numbers<[1], [0], [0], [1], [0, 0, 1, 1], [], []>} : vector<32x32xbf16>, vector<32x32xbf16>, vector<32x32xf32> -> vector<32x32xf32>
    %3 = arith.truncf %2 : vector<32x32xf32> to vector<32x32xbf16>
    %c0_3 = arith.constant 0 : index
    %c0_4 = arith.constant 0 : index
    %4 = vector.load %arg4[%c0_3, %c0_4] : memref<32x32xbf16, #tpu.memory_space<vmem>>, vector<32x32xbf16>
    tpu.vector_store %arg4[%c0_3, %c0_4], %3 {strides = array<i32>} : memref<32x32xbf16, #tpu.memory_space<vmem>>, vector<32x32xbf16>,
    return
  }
  func.func @transform_0(%arg0: i32, %arg1: i32) -> (i32, i32) {
    %c0_i32 = arith.constant 0 : i32
    %c0_i32_0 = arith.constant 0 : i32
    return %arg1, %c0_i32 : i32, i32
  }
  func.func @transform_1(%arg0: i32, %arg1: i32) -> (i32, i32) {
    %c0_i32 = arith.constant 0 : i32
    %c0_i32_0 = arith.constant 0 : i32
    return %c0_i32, %arg0 : i32, i32
  }
  func.func @transform_2(%arg0: i32, %arg1: i32) -> (i32, i32) {
    %c0_i32 = arith.constant 0 : i32
    return %arg1, %arg0 : i32, i32
  }
}

</mosaic_0001>

<bundles_post_ra>
// kernel: tpu_custom_call.1
= control target key start
LH: loop header
LB: loop body
LE: loop exit
PB: predicated region body
PF: predicated region fallthrough
CT: control target
= control target key end

     0   :  { %7 = vsyncpa [#allocation3], 0  ;;  %s338_s0 = inlined_call_operand.hbm [shape: bf16[32,32], index: 0, kind: input, shape index: {}]   ;;  %s339_s1 = inlined_call_operand.hbm [shape: bf16[32,32], index: 1, kind: input, shape index: {}]   ;;  %s340_s2 = inlined_call_operand.hbm [shape: bf16[32,32], index: 2, kind: output, shape index: {}]  }
   0x1   :  { %8 = vsyncpa [#allocation6], 0 }
   0x2   :  { %9 = vsyncpa [#allocation4], 0  ;;  %s273_s9 = smov [#allocation2]   ;;  %s201_s13 = scalar_lea.hbm %s338_s0, 256 }
   0x3   :  { %s15_s10 = sshll.u32 %s273_s9, 4  ;;  %p202_p0 = scmp.ne.s32.totalorder %s338_s0, %s201_s13  ;;  %s16_s10 = int_to_ptr.vmem [resolvable:$true] %s15_s10 }
   0x4   :  { %p205_p1 = scmp.lt.u32.totalorder %s201_s13, %s338_s0 }
   0x6   :  { %p207_p2 = pnand %p205_p1, %p202_p0 }
   0x8   :  { %210 = shalt.err (!%p207_p2)
}
   0x9   :  { %s211_s18 = scalar_lea.vmem %s16_s10, 256  ;;  %p216_p4 = scmp.lt.s32.totalorder %s16_s10, %s16_s10 }
   0xa   :  { %p212_p3 = scmp.ne.s32.totalorder %s16_s10, %s211_s18  ;;  %p217_p5 = scmp.lt.s32.totalorder %s211_s18, %s211_s18 }
   0xc   :  { %p218_p6 = por %p217_p5, %p216_p4 }
   0xe   :  { %p219_p7 = pnand %p218_p6, %p212_p3 }
  0x10   :  { %222 = shalt.err (!%p219_p7)
}
  0x11   :  { %s274_s19 = smov 64   ;;  %s275_s20 = smov 4  }
  0x12   :  { %21 = dma.hbm_to_vmem [thread:$0]  %s338_s0, 256, %s16_s10, [#allocation3], %s274_s19, %s274_s19, %s275_s20  }
  0x13   :  { %s276_s23 = smov [#allocation5]   ;;  %s223_s27 = scalar_lea.hbm %s339_s1, 256 }
  0x14   :  { %s27_s24 = sshll.u32 %s276_s23, 4  ;;  %p224_p8 = scmp.ne.s32.totalorder %s339_s1, %s223_s27  ;;  %s28_s24 = int_to_ptr.vmem [resolvable:$true] %s27_s24 }
  0x15   :  { %p227_p9 = scmp.lt.u32.totalorder %s223_s27, %s339_s1 }
  0x17   :  { %p229_p10 = pnand %p227_p9, %p224_p8 }
  0x19   :  { %232 = shalt.err (!%p229_p10)
}
  0x1a   :  { %s233_s4 = scalar_lea.vmem %s28_s24, 256  ;;  %p238_p12 = scmp.lt.s32.totalorder %s28_s24, %s28_s24 }
  0x1b   :  { %p234_p11 = scmp.ne.s32.totalorder %s28_s24, %s233_s4  ;;  %p239_p13 = scmp.lt.s32.totalorder %s233_s4, %s233_s4 }
  0x1d   :  { %p240_p0 = por %p239_p13, %p238_p12 }
  0x1f   :  { %p241_p1 = pnand %p240_p0, %p234_p11 }
  0x21   :  { %244 = shalt.err (!%p241_p1)
}
  0x22   :  { %33 = dma.hbm_to_vmem [thread:$0]  %s339_s1, 256, %s28_s24, [#allocation6], %s274_s19, %s274_s19, %s275_s20  }
  0x23   :  { %267 = dma.done.wait [#allocation3], 256  }
  0x24   :  { %268 = vsyncadd [#allocation3], 4294967040 }
  0x25   :  { %269 = dma.done.wait [#allocation6], 256  }
  0x26   :  { %270 = vsyncadd [#allocation6], 4294967040  ;;  %v197_v0 = vld [vmem:[#allocation5] sm:$0xff]   ;;  %v198_v1 = vld [vmem:[#allocation5 + $0x8] sm:$0xff]   ;;  %vm71_vm0 = vcmask 261120   ;;  %vm143_vm1 = vcmask 257024  }
  0x27   :  { %184 = vmatprep.subr.bf16.mxu0 %v197_v0  ;;  %v199_v2 = vld [vmem:[#allocation2] sm:$0xff]   ;;  %v200_v3 = vld [vmem:[#allocation2 + $0x8] sm:$0xff]   ;;  %s277_s1 = smov [#allocation7]  }
  0x28   :  { %185 = vmatpush3.bf16.msra.mxu0 %v197_v0  ;;  %188 = vmatprep.mubr.msk.bf16.mxu0 %vm71_vm0, %v199_v2  ;;  %s153_s6 = sshll.u32 %s277_s1, 4  ;;  %s154_s6 = int_to_ptr.vmem [resolvable:$true] %s153_s6 }
  0x29   :  { %186 = vmatprep.subr.bf16.mxu0 %v198_v1  ;;  %s245_s7 = scalar_lea.vmem %s154_s6, 256  ;;  %p250_p3 = scmp.lt.s32.totalorder %s154_s6, %s154_s6 }
  0x2a   :  { %p246_p2 = scmp.ne.s32.totalorder %s154_s6, %s245_s7  ;;  %p251_p4 = scmp.lt.s32.totalorder %s245_s7, %s245_s7 }
  0x2c   :  { %187 = vmatpush3.bf16.msra.mxu0 %v198_v1  ;;  %p252_p5 = por %p251_p4, %p250_p3 }
  0x2e   :  { %p253_p6 = pnand %p252_p5, %p246_p2 }
  0x2f   :  { %189 = vmatmul.mubr.msk.bf16.vlgmr.msra.gmra.mrb[0].mxu0 %vm71_vm0, %v200_v3 }
 0x102   :  { %v190_v4 = vpop.f32.mrb[0].mxu0 }
 0x103   :  { %v178_v5 = vpack.c.bf16 %v190_v4, %v190_v4  ;;  %v112_v6 = vpop.f32.mrb[1].mxu0 }
 0x104   :  { %v176_v7 = vpack.c.bf16 %v112_v6, %v112_v6  ;;  %v191_v8 = vpop.f32.mrb[2].mxu0 }
 0x105   :  { %146 = vst.msk [vmem:[#allocation7 + $0x8] sm:$0xf] %vm143_vm1, %v178_v5  ;;  %v179_v9 = vpack.c.bf16 %v191_v8, %v191_v8  ;;  %v115_v10 = vpop.f32.mrb[3].mxu0 }
 0x106   :  { %144 = vst.msk [vmem:[#allocation7] sm:$0xf] %vm143_vm1, %v176_v7  ;;  %v177_v11 = vpack.c.bf16 %v115_v10, %v115_v10 }
 0x107   :  { %147 = vst.msk [vmem:[#allocation7 + $0xc] sm:$0xf] %vm143_vm1, %v179_v9 }
 0x108   :  { %145 = vst.msk [vmem:[#allocation7 + $0x4] sm:$0xf] %vm143_vm1, %v177_v11 }
 0x109   :  { %256 = shalt.err (!%p253_p6)
}
 0x10a   :  { %s257_s10 = scalar_lea.hbm %s340_s2, 256 }
 0x10b   :  { %p258_p7 = scmp.ne.s32.totalorder %s340_s2, %s257_s10  ;;  %p261_p8 = scmp.lt.u32.totalorder %s257_s10, %s340_s2 }
 0x10d   :  { %p263_p9 = pnand %p261_p8, %p258_p7 }
 0x10f   :  { %266 = shalt.err (!%p263_p9)
}
 0x110   :  { %159 = dma.vmem_to_hbm [thread:$0]  %s154_s6, 256, %s340_s2, [#allocation4], %s274_s19, %s274_s19, %s275_s20  }
 0x111   :  { %271 = dma.done.wait [#allocation4], 256  }
 0x112   :  { %272 = vsyncadd [#allocation4], 4294967040 }
 0x113   :  { %163 = vsyncpa [#allocation3], 1 }
 0x114   :  { %164 = vsyncpa [#allocation6], 1 }
 0x115   :  { %165 = vsyncpa [#allocation4], 1 }

</bundles_post_ra>
